<compile_context>
chip_gen: v5e
topology: v5e:2x2
jax: 0.10.0
libtpu: 0.0.40
codegen_flags: <defaults>
</compile_context>

<pallas_src>
import functools

import jax
import jax.numpy as jnp
import numpy as np
from jax.experimental import pallas as pl
from jax.experimental.pallas import tpu as pltpu


def _round_up(a, m):
    return -(-a // m) * m


def _temporal_block_kernel(halo_ref, x_ref, w1_ref, b1_ref, w2_ref, b2_ref,
                           wd_ref, bd_ref, o_ref, *, K, dil, pad, extra, Lt,
                           Lep, has_downsample, compute_dtype):
    l = pl.program_id(1)
    Hl = halo_ref.shape[-1]

    # Extended input window covering [tile_start - Hl, tile_start + Lt) lanes.
    xe = jnp.concatenate([halo_ref[...], x_ref[...]], axis=-1)  # (C_in, Hl+Lt)

    # ---- conv1 (dilated, causal): im2col -> single MXU matmul --------------
    # conv1 output is evaluated over Lep positions starting at
    # global t = tile_start - pad - extra (128-aligned extended range).
    base = Hl - 2 * pad - extra
    cols1 = jnp.concatenate(
        [xe[:, base + j * dil: base + j * dil + Lep] for j in range(K)],
        axis=0)                                                 # (K*C_in, Lep)
    acc1 = jnp.dot(w1_ref[...], cols1, preferred_element_type=jnp.float32)
    h1 = jnp.maximum(acc1 + b1_ref[...], 0.0)       # bias + ReLU (dropout1=id)

    # conv2's causal zero padding: positions with global t < 0 must be zero,
    # not ReLU(bias) of virtual positions.
    thresh = jnp.maximum(pad + extra - l * Lt, 0)
    lane = jax.lax.broadcasted_iota(jnp.int32, (1, Lep), 1)
    h1 = jnp.where(lane >= thresh, h1, 0.0).astype(compute_dtype)

    # ---- conv2 (dilated, causal): im2col -> single MXU matmul --------------
    cols2 = jnp.concatenate(
        [h1[:, extra + j * dil: extra + j * dil + Lt] for j in range(K)],
        axis=0)                                                 # (K*C_out, Lt)
    acc2 = jnp.dot(w2_ref[...], cols2, preferred_element_type=jnp.float32)
    h2 = jnp.maximum(acc2 + b2_ref[...], 0.0)       # bias + ReLU (dropout2=id)

    # ---- residual branch + final ReLU ---------------------------------------
    if has_downsample:
        res = jnp.dot(wd_ref[...], x_ref[...],
                      preferred_element_type=jnp.float32) + bd_ref[...]
    else:
        res = x_ref[...].astype(jnp.float32)
    o_ref[...] = jnp.maximum(h2 + res, 0.0).astype(o_ref.dtype)


def temporal_block(x_ncl, w1, b1, w2, b2, wd, bd, *, kernel_size, dilation,
                   compute_dtype=jnp.bfloat16, block_len=None):
    """TemporalBlock forward (eval mode).

    x_ncl : (N, C_in, L)          -- PyTorch NCL layout
    w1    : (C_out, C_in, K)      -- conv1 weight (weight_norm already applied)
    w2    : (C_out, C_out, K)     -- conv2 weight
    wd    : (C_out, C_in, 1)|None -- 1x1 downsample weight
    Returns (N, C_out, L) in x_ncl.dtype.
    """
    N, C_in, L = x_ncl.shape
    C_out = w1.shape[0]
    K = kernel_size
    pad = (K - 1) * dilation
    has_downsample = wd is not None
    out_dtype = x_ncl.dtype
    c_item = jnp.dtype(compute_dtype).itemsize
    o_item = jnp.dtype(out_dtype).itemsize

    # --- lane geometry: everything the kernel touches is 128-lane aligned ----
    pad128 = _round_up(pad, 128)            # conv1 extended-range extension
    extra = pad128 - pad
    Hl = max(128, _round_up(2 * pad + extra, 128))   # causal halo width
    L_need = _round_up(L, 128)

    # --- per-generation VMEM budgeting ---------------------------------------
    try:
        vmem_cap = int(getattr(pltpu.get_tpu_info(), "vmem_capacity_bytes", 0))
    except Exception:
        vmem_cap = 0
    if vmem_cap > 0:
        vmem_limit = int(0.85 * vmem_cap)     # v5e/v6e ~109MiB, v7x ~54MiB
        budget = int(0.50 * vmem_limit)
    else:
        vmem_limit = None                     # keep compiler default
        budget = 12 * 1024 * 1024

    def per_step_bytes(lt):
        lep = lt + pad128
        b = 2 * C_in * (lt + Hl) * c_item               # 2x-buffered x + halo
        b += 2 * C_out * lt * o_item                    # 2x-buffered output
        b += C_in * (Hl + lt) * c_item                  # xe
        b += K * C_in * lep * c_item                    # cols1
        b += 2 * C_out * lep * 4 + C_out * lep * c_item  # acc1 / h1
        b += K * C_out * lt * c_item                    # cols2
        b += 3 * C_out * lt * 4                         # acc2 / res / final
        return b

    if block_len is None:
        lt = 128
        while lt * 2 <= L_need and per_step_bytes(lt * 2) <= budget:
            lt *= 2
        block_len = lt
    Lt = max(128, _round_up(int(block_len), 128))
    n_l = -(-L_need // Lt)
    Ltot = n_l * Lt
    Lep = Lt + pad128

    # --- host-side data prep (NCL preserved, no transposes) -------------------
    x_c = x_ncl.astype(compute_dtype)
    xpad = jnp.pad(x_c, ((0, 0), (0, 0), (Hl, Ltot - L)))
    xm = xpad[:, :, Hl:]                                   # (N, C_in, Ltot)
    # Left halo of each L tile (zeros before t=0).  n_l static slices.
    halo = jnp.concatenate(
        [xpad[:, :, l * Lt: l * Lt + Hl] for l in range(n_l)], axis=-1)

    # Weights in im2col form: column block j holds tap j.
    w1r = jnp.transpose(w1, (0, 2, 1)).reshape(C_out, K * C_in).astype(compute_dtype)
    w2r = jnp.transpose(w2, (0, 2, 1)).reshape(C_out, K * C_out).astype(compute_dtype)
    b1c = b1.reshape(C_out, 1).astype(jnp.float32)
    b2c = b2.reshape(C_out, 1).astype(jnp.float32)
    if has_downsample:
        wdr = wd[:, :, 0].astype(compute_dtype)
        bdc = bd.reshape(C_out, 1).astype(jnp.float32)
    else:
        wdr = jnp.zeros((C_out, C_in), compute_dtype)      # unused dummies
        bdc = jnp.zeros((C_out, 1), jnp.float32)

    kernel = functools.partial(
        _temporal_block_kernel, K=K, dil=dilation, pad=pad, extra=extra,
        Lt=Lt, Lep=Lep, has_downsample=has_downsample,
        compute_dtype=compute_dtype)

    flops = 2 * N * n_l * (K * C_in * C_out * Lep + K * C_out * C_out * Lt
                           + (C_in * C_out * Lt if has_downsample else 0))
    bytes_accessed = int(
        xm.size * c_item + halo.size * c_item
        + (w1r.size + w2r.size + wdr.size) * c_item
        + (b1c.size + b2c.size + bdc.size) * 4
        + N * C_out * Ltot * o_item)

    out = pl.pallas_call(
        kernel,
        out_shape=jax.ShapeDtypeStruct((N, C_out, Ltot), out_dtype),
        grid=(N, n_l),
        in_specs=[
            pl.BlockSpec((None, C_in, Hl), lambda n, l: (n, 0, l)),
            pl.BlockSpec((None, C_in, Lt), lambda n, l: (n, 0, l)),
            pl.BlockSpec((C_out, K * C_in), lambda n, l: (0, 0)),
            pl.BlockSpec((C_out, 1), lambda n, l: (0, 0)),
            pl.BlockSpec((C_out, K * C_out), lambda n, l: (0, 0)),
            pl.BlockSpec((C_out, 1), lambda n, l: (0, 0)),
            pl.BlockSpec((C_out, C_in), lambda n, l: (0, 0)),
            pl.BlockSpec((C_out, 1), lambda n, l: (0, 0)),
        ],
        out_specs=pl.BlockSpec((None, C_out, Lt), lambda n, l: (n, 0, l)),
        compiler_params=pltpu.CompilerParams(
            dimension_semantics=("parallel", "parallel"),
            vmem_limit_bytes=vmem_limit),
        cost_estimate=pl.CostEstimate(flops=flops, transcendentals=0,
                                      bytes_accessed=bytes_accessed),
    )(halo, xm, w1r, b1c, w2r, b2c, wdr, bdc)

    return out[:, :, :L]


# ----------------------- parameter construction (glue) ----------------------
def _weight_norm_weight(v_key, g_key, shape):
    """Effective weight of torch.nn.utils.weight_norm: w = g * v / ||v||,
    norm taken per output channel (dim=0)."""
    v = 0.01 * jax.random.normal(v_key, shape, jnp.float32)
    g = jax.random.uniform(g_key, (shape[0], 1, 1), jnp.float32, 0.5, 1.5)
    norm = jnp.sqrt(jnp.sum(v * v, axis=(1, 2), keepdims=True))
    return g * v / norm


# ------------------------- pure-JAX reference (check) -----------------------
def _ref_forward(x, w1, b1, w2, b2, wd, bd, kernel_size, dilation):
    pad = (kernel_size - 1) * dilation

    def conv_block(inp, w, b):
        y = jax.lax.conv_general_dilated(
            inp, w, window_strides=(1,), padding=[(pad, pad)],
            rhs_dilation=(dilation,), dimension_numbers=('NCH', 'OIH', 'NCH'),
            precision=jax.lax.Precision.HIGHEST)
        y = y[:, :, :-pad]                                # Chomp1d
        return jnp.maximum(y + b[None, :, None], 0.0)     # ReLU (dropout=id)

    out = conv_block(conv_block(x, w1, b1), w2, b2)
    if wd is not None:
        res = jax.lax.conv_general_dilated(
            x, wd, (1,), [(0, 0)], dimension_numbers=('NCH', 'OIH', 'NCH'),
            precision=jax.lax.Precision.HIGHEST)
        res = res + bd[None, :, None]
    else:
        res = x
    return jnp.maximum(out + res, 0.0)


if __name__ == "__main__":
    # TemporalBlock(n_inputs=4, n_outputs=8, kernel_size=3, stride=1,
    #               dilation=2, padding=(3-1)*2=4, dropout=0.2)  -- eval mode
    N, C_in, C_out, L = 2, 4, 8, 16
    K, dilation = 3, 2

    key = jax.random.PRNGKey(0)
    ks = jax.random.split(key, 10)

    x = jax.random.normal(ks[0], (N, C_in, L), jnp.float32)
    w1 = _weight_norm_weight(ks[1], ks[2], (C_out, C_in, K))
    b1 = 0.1 * jax.random.normal(ks[3], (C_out,), jnp.float32)
    w2 = _weight_norm_weight(ks[4], ks[5], (C_out, C_out, K))
    b2 = 0.1 * jax.random.normal(ks[6], (C_out,), jnp.float32)
    wd = 0.01 * jax.random.normal(ks[7], (C_out, C_in, 1), jnp.float32)
    bd = 0.05 * jax.random.normal(ks[8], (C_out,), jnp.float32)

    ref = _ref_forward(x, w1, b1, w2, b2, wd, bd, K, dilation)

    # 1) float32 compute path -- tight check against the f32 reference.
    out_f32 = temporal_block(x, w1, b1, w2, b2, wd, bd, kernel_size=K,
                             dilation=dilation, compute_dtype=jnp.float32)
    out_f32 = jax.block_until_ready(out_f32)
    assert out_f32.shape == (N, C_out, L)
    assert np.allclose(np.asarray(out_f32), np.asarray(ref), rtol=1e-4, atol=1e-5)

    # 2) bfloat16 compute path (default; f32 accumulation) -- compare against
    #    the reference evaluated on bf16-rounded inputs/weights.  Note: h1 is
    #    also rounded to bf16 between the convs (documented accuracy delta).
    q = lambda a: a.astype(jnp.bfloat16).astype(jnp.float32)
    ref_bf = _ref_forward(q(x), q(w1), b1, q(w2), b2, q(wd), bd, K, dilation)
    out_bf = temporal_block(x, w1, b1, w2, b2, wd, bd, kernel_size=K,
                            dilation=dilation)
    out_bf = jax.block_until_ready(out_bf)
    assert out_bf.shape == (N, C_out, L)
    assert np.allclose(np.asarray(out_bf), np.asarray(ref_bf), rtol=3e-2, atol=3e-2)

    # 3) identity-residual branch (n_inputs == n_outputs -> no downsample).
    x2 = jax.random.normal(ks[9], (N, C_out, L), jnp.float32)
    w1b = _weight_norm_weight(ks[1], ks[2], (C_out, C_out, K))
    ref2 = _ref_forward(x2, w1b, b1, w2, b2, None, None, K, dilation)
    out2 = temporal_block(x2, w1b, b1, w2, b2, None, None, kernel_size=K,
                          dilation=dilation, compute_dtype=jnp.float32)
    out2 = jax.block_until_ready(out2)
    assert np.allclose(np.asarray(out2), np.asarray(ref2), rtol=1e-4, atol=1e-5)

    print("KERNEL_OK")
</pallas_src>

<mosaic_0001>
module attributes {stable_mosaic.version = 11 : i64} {
  func.func @_temporal_block_kernel(%arg0: i32, %arg1: i32, %arg2: memref<1x4x256xf32, #tpu.memory_space<vmem>>, %arg3: memref<1x4x128xf32, #tpu.memory_space<vmem>>, %arg4: memref<8x12xf32, #tpu.memory_space<vmem>>, %arg5: memref<8x1xf32, #tpu.memory_space<vmem>>, %arg6: memref<8x24xf32, #tpu.memory_space<vmem>>, %arg7: memref<8x1xf32, #tpu.memory_space<vmem>>, %arg8: memref<8x4xf32, #tpu.memory_space<vmem>>, %arg9: memref<8x1xf32, #tpu.memory_space<vmem>>, %arg10: memref<1x8x128xf32, #tpu.memory_space<vmem>>) attributes {dimension_semantics = [#tpu.dimension_semantics<parallel>, #tpu.dimension_semantics<parallel>], iteration_bounds = array<i64: 2, 1>, scalar_prefetch = 0 : i64, scratch_operands = 0 : i64, tpu.core_type = #tpu.core_type<tc>, window_params = [{transform_indices = @transform_0, window_bounds = array<i64: 1, 4, 256>}, {transform_indices = @transform_1, window_bounds = array<i64: 1, 4, 128>}, {pipeline_mode = #tpu.pipeline_mode<synchronous>, transform_indices = @transform_2, window_bounds = array<i64: 8, 12>}, {pipeline_mode = #tpu.pipeline_mode<synchronous>, transform_indices = @transform_3, window_bounds = array<i64: 8, 1>}, {pipeline_mode = #tpu.pipeline_mode<synchronous>, transform_indices = @transform_4, window_bounds = array<i64: 8, 24>}, {pipeline_mode = #tpu.pipeline_mode<synchronous>, transform_indices = @transform_5, window_bounds = array<i64: 8, 1>}, {pipeline_mode = #tpu.pipeline_mode<synchronous>, transform_indices = @transform_6, window_bounds = array<i64: 8, 4>}, {pipeline_mode = #tpu.pipeline_mode<synchronous>, transform_indices = @transform_7, window_bounds = array<i64: 8, 1>}, {transform_indices = @transform_8, window_bounds = array<i64: 1, 8, 128>}]} {
    %c0 = arith.constant 0 : index
    %c0_0 = arith.constant 0 : index
    %c0_1 = arith.constant 0 : index
    %0 = vector.load %arg2[%c0, %c0_0, %c0_1] : memref<1x4x256xf32, #tpu.memory_space<vmem>>, vector<1x4x256xf32>
    %1 = vector.shape_cast %0 : vector<1x4x256xf32> to vector<4x256xf32>
    %c0_2 = arith.constant 0 : index
    %c0_3 = arith.constant 0 : index
    %c0_4 = arith.constant 0 : index
    %2 = vector.load %arg3[%c0_2, %c0_3, %c0_4] : memref<1x4x128xf32, #tpu.memory_space<vmem>>, vector<1x4x128xf32>
    %3 = vector.shape_cast %2 : vector<1x4x128xf32> to vector<4x128xf32>
    %4 = tpu.concatenate %1, %3 in 1 : vector<4x256xf32>, vector<4x128xf32> -> vector<4x384xf32>
    %5 = vector.extract_strided_slice %4 {offsets = [0, 124], sizes = [4, 256], strides = [1, 1]} : vector<4x384xf32> to vector<4x256xf32>
    %6 = vector.extract_strided_slice %4 {offsets = [0, 126], sizes = [4, 256], strides = [1, 1]} : vector<4x384xf32> to vector<4x256xf32>
    %7 = vector.extract_strided_slice %4 {offsets = [0, 128], sizes = [4, 256], strides = [1, 1]} : vector<4x384xf32> to vector<4x256xf32>
    %8 = tpu.concatenate %5, %6, %7 in 0 : vector<4x256xf32>, vector<4x256xf32>, vector<4x256xf32> -> vector<12x256xf32>
    %c0_5 = arith.constant 0 : index
    %c0_6 = arith.constant 0 : index
    %9 = vector.load %arg4[%c0_5, %c0_6] : memref<8x12xf32, #tpu.memory_space<vmem>>, vector<8x12xf32>
    %cst = arith.constant dense<0.000000e+00> : vector<8x256xf32>
    %10 = tpu.matmul %9, %8, %cst {dimension_numbers = #tpu.dot_dimension_numbers<[1], [0], [0], [1], [0, 0, 1, 1], [], []>} : vector<8x12xf32>, vector<12x256xf32>, vector<8x256xf32> -> vector<8x256xf32>
    %c0_7 = arith.constant 0 : index
    %c0_8 = arith.constant 0 : index
    %11 = vector.load %arg5[%c0_7, %c0_8] : memref<8x1xf32, #tpu.memory_space<vmem>>, vector<8x1xf32>
    %12 = vector.broadcast %11 : vector<8x1xf32> to vector<8x256xf32>
    %13 = arith.addf %10, %12 : vector<8x256xf32>
    %cst_9 = arith.constant 0.000000e+00 : f32
    %14 = vector.broadcast %cst_9 : f32 to vector<8x256xf32>
    %15 = arith.maximumf %13, %14 : vector<8x256xf32>
    %c128_i32 = arith.constant 128 : i32
    %16 = arith.muli %arg1, %c128_i32 : i32
    %c128_i32_10 = arith.constant 128 : i32
    %17 = arith.subi %c128_i32_10, %16 : i32
    %c0_i32 = arith.constant 0 : i32
    %18 = arith.maxsi %17, %c0_i32 : i32
    %19 = tpu.iota {dimensions = array<i32: 1>} : vector<1x256xi32>
    %20 = vector.broadcast %18 : i32 to vector<1x256xi32>
    %21 = arith.cmpi sge, %19, %20 : vector<1x256xi32>
    %cst_11 = arith.constant 0.000000e+00 : f32
    %22 = vector.shape_cast %21 : vector<1x256xi1> to vector<1x256xi1>
    %23 = vector.broadcast %22 : vector<1x256xi1> to vector<8x256xi1>
    %24 = vector.broadcast %cst_11 : f32 to vector<8x256xf32>
    %25 = arith.select %23, %15, %24 : vector<8x256xi1>, vector<8x256xf32>
    %26 = vector.extract_strided_slice %25 {offsets = [0, 124], sizes = [8, 128], strides = [1, 1]} : vector<8x256xf32> to vector<8x128xf32>
    %27 = vector.extract_strided_slice %25 {offsets = [0, 126], sizes = [8, 128], strides = [1, 1]} : vector<8x256xf32> to vector<8x128xf32>
    %28 = vector.extract_strided_slice %25 {offsets = [0, 128], sizes = [8, 128], strides = [1, 1]} : vector<8x256xf32> to vector<8x128xf32>
    %29 = tpu.concatenate %26, %27, %28 in 0 : vector<8x128xf32>, vector<8x128xf32>, vector<8x128xf32> -> vector<24x128xf32>
    %c0_12 = arith.constant 0 : index
    %c0_13 = arith.constant 0 : index
    %30 = vector.load %arg6[%c0_12, %c0_13] : memref<8x24xf32, #tpu.memory_space<vmem>>, vector<8x24xf32>
    %cst_14 = arith.constant dense<0.000000e+00> : vector<8x128xf32>
    %31 = tpu.matmul %30, %29, %cst_14 {dimension_numbers = #tpu.dot_dimension_numbers<[1], [0], [0], [1], [0, 0, 1, 1], [], []>} : vector<8x24xf32>, vector<24x128xf32>, vector<8x128xf32> -> vector<8x128xf32>
    %c0_15 = arith.constant 0 : index
    %c0_16 = arith.constant 0 : index
    %32 = vector.load %arg7[%c0_15, %c0_16] : memref<8x1xf32, #tpu.memory_space<vmem>>, vector<8x1xf32>
    %33 = vector.broadcast %32 : vector<8x1xf32> to vector<8x128xf32>
    %34 = arith.addf %31, %33 : vector<8x128xf32>
    %cst_17 = arith.constant 0.000000e+00 : f32
    %35 = vector.broadcast %cst_17 : f32 to vector<8x128xf32>
    %36 = arith.maximumf %34, %35 : vector<8x128xf32>
    %c0_18 = arith.constant 0 : index
    %c0_19 = arith.constant 0 : index
    %37 = vector.load %arg8[%c0_18, %c0_19] : memref<8x4xf32, #tpu.memory_space<vmem>>, vector<8x4xf32>
    %c0_20 = arith.constant 0 : index
    %c0_21 = arith.constant 0 : index
    %c0_22 = arith.constant 0 : index
    %38 = vector.load %arg3[%c0_20, %c0_21, %c0_22] : memref<1x4x128xf32, #tpu.memory_space<vmem>>, vector<1x4x128xf32>
    %39 = vector.shape_cast %38 : vector<1x4x128xf32> to vector<4x128xf32>
    %cst_23 = arith.constant dense<0.000000e+00> : vector<8x128xf32>
    %40 = tpu.matmul %37, %39, %cst_23 {dimension_numbers = #tpu.dot_dimension_numbers<[1], [0], [0], [1], [0, 0, 1, 1], [], []>} : vector<8x4xf32>, vector<4x128xf32>, vector<8x128xf32> -> vector<8x128xf32>
    %c0_24 = arith.constant 0 : index
    %c0_25 = arith.constant 0 : index
    %41 = vector.load %arg9[%c0_24, %c0_25] : memref<8x1xf32, #tpu.memory_space<vmem>>, vector<8x1xf32>
    %42 = vector.broadcast %41 : vector<8x1xf32> to vector<8x128xf32>
    %43 = arith.addf %40, %42 : vector<8x128xf32>
    %44 = arith.addf %36, %43 : vector<8x128xf32>
    %cst_26 = arith.constant 0.000000e+00 : f32
    %45 = vector.broadcast %cst_26 : f32 to vector<8x128xf32>
    %46 = arith.maximumf %44, %45 : vector<8x128xf32>
    %c0_27 = arith.constant 0 : index
    %c0_28 = arith.constant 0 : index
    %c0_29 = arith.constant 0 : index
    %47 = vector.load %arg10[%c0_27, %c0_28, %c0_29] : memref<1x8x128xf32, #tpu.memory_space<vmem>>, vector<1x8x128xf32>
    %48 = vector.shape_cast %47 : vector<1x8x128xf32> to vector<8x128xf32>
    %49 = vector.shape_cast %46 : vector<8x128xf32> to vector<1x8x128xf32>
    tpu.vector_store %arg10[%c0_27, %c0_28, %c0_29], %49 {strides = array<i32>} : memref<1x8x128xf32, #tpu.memory_space<vmem>>, vector<1x8x128xf32>,
    return
  }
  func.func @transform_0(%arg0: i32, %arg1: i32) -> (i32, i32, i32) {
    %c0_i32 = arith.constant 0 : i32
    %c0_i32_0 = arith.constant 0 : i32
    return %arg0, %c0_i32, %arg1 : i32, i32, i32
  }
  func.func @transform_1(%arg0: i32, %arg1: i32) -> (i32, i32, i32) {
    %c0_i32 = arith.constant 0 : i32
    %c0_i32_0 = arith.constant 0 : i32
    return %arg0, %c0_i32, %arg1 : i32, i32, i32
  }
  func.func @transform_2(%arg0: i32, %arg1: i32) -> (i32, i32) {
    %c0_i32 = arith.constant 0 : i32
    %c0_i32_0 = arith.constant 0 : i32
    %c0_i32_1 = arith.constant 0 : i32
    return %c0_i32, %c0_i32_0 : i32, i32
  }
  func.func @transform_3(%arg0: i32, %arg1: i32) -> (i32, i32) {
    %c0_i32 = arith.constant 0 : i32
    %c0_i32_0 = arith.constant 0 : i32
    %c0_i32_1 = arith.constant 0 : i32
    return %c0_i32, %c0_i32_0 : i32, i32
  }
  func.func @transform_4(%arg0: i32, %arg1: i32) -> (i32, i32) {
    %c0_i32 = arith.constant 0 : i32
    %c0_i32_0 = arith.constant 0 : i32
    %c0_i32_1 = arith.constant 0 : i32
    return %c0_i32, %c0_i32_0 : i32, i32
  }
  func.func @transform_5(%arg0: i32, %arg1: i32) -> (i32, i32) {
    %c0_i32 = arith.constant 0 : i32
    %c0_i32_0 = arith.constant 0 : i32
    %c0_i32_1 = arith.constant 0 : i32
    return %c0_i32, %c0_i32_0 : i32, i32
  }
  func.func @transform_6(%arg0: i32, %arg1: i32) -> (i32, i32) {
    %c0_i32 = arith.constant 0 : i32
    %c0_i32_0 = arith.constant 0 : i32
    %c0_i32_1 = arith.constant 0 : i32
    return %c0_i32, %c0_i32_0 : i32, i32
  }
  func.func @transform_7(%arg0: i32, %arg1: i32) -> (i32, i32) {
    %c0_i32 = arith.constant 0 : i32
    %c0_i32_0 = arith.constant 0 : i32
    %c0_i32_1 = arith.constant 0 : i32
    return %c0_i32, %c0_i32_0 : i32, i32
  }
  func.func @transform_8(%arg0: i32, %arg1: i32) -> (i32, i32, i32) {
    %c0_i32 = arith.constant 0 : i32
    %c0_i32_0 = arith.constant 0 : i32
    return %arg0, %c0_i32, %arg1 : i32, i32, i32
  }
}

</mosaic_0001>

<bundles_post_ra>
// kernel: tpu_custom_call.1
= control target key start
LH: loop header
LB: loop body
LE: loop exit
PB: predicated region body
PF: predicated region fallthrough
CT: control target
= control target key end

     0   :  { %13 = vsyncpa [#allocation3], 0  ;;  %s1081_s0 = inlined_call_operand.vmem [shape: f32[2,4,256], index: 0, kind: input, shape index: {}]   ;;  %s1082_s1 = inlined_call_operand.vmem [shape: f32[2,4,128], index: 1, kind: input, shape index: {}]   ;;  %s1083_s2 = inlined_call_operand.vmem [shape: f32[8,12], index: 2, kind: input, shape index: {}]   ;;  %s1084_s3 = inlined_call_operand.vmem [shape: f32[8,1], index: 3, kind: input, shape index: {}]   ;;  %s1085_s4 = inlined_call_operand.vmem [shape: f32[8,24], index: 4, kind: input, shape index: {}]   ;;  %s1086_s5 = inlined_call_operand.vmem [shape: f32[8,1], index: 5, kind: input, shape index: {}]   ;;  %s1087_s6 = inlined_call_operand.vmem [shape: f32[8,4], index: 6, kind: input, shape index: {}]   ;;  %s1088_s7 = inlined_call_operand.vmem [shape: f32[8,1], index: 7, kind: input, shape index: {}]   ;;  %s1089_s8 = inlined_call_operand.hbm [shape: f32[2,8,128], index: 8, kind: output, shape index: {}]  }
   0x1   :  { %15 = vsyncpa [#allocation3 + $0x1], 0  ;;  %s927_s27 = smov 0   ;;  %s929_s28 = smov 0  }
   0x2   :  { %s931_s29 = smov 0   ;;  %s933_s30 = smov 0  }
   0x3   :  { %s935_s9 = smov 0   ;;  %s937_s10 = smov 0  }
   0x4 LB: > { %s688_s11 = sadd.s32 4294967295, %s875_s10   ;;  %s689_s12 = sadd.s32 4294967294, %s875_s10   ;;  %s875_s10 = sphi %s937_s10, %s21_s10   ;;  %s871_s9 = sphi %s935_s9, %s1096_s9   ;;  %s867_s30 = sphi %s933_s30, %s1095_s30   ;;  %s863_s29 = sphi %s931_s29, %s1094_s29   ;;  %s859_s28 = sphi %s929_s28, %s1093_s28   ;;  %s855_s27 = sphi %s927_s27, %s1092_s27  }
   0x5   : > { %s33_s13 = sadd.s32 1, %s871_s9  ;;  %s224_s14 = sadd.s32 1, %s863_s29 }
   0x6   : > { %p35_p0 = scmp.ge.s32.totalorder %s33_s13, 2  ;;  %p234_p1 = scmp.ne.s32.totalorder %s863_s29, %s859_s28 }
   0x7   : > { %p235_p2 = scmp.eq.s32.totalorder %s688_s11, 1  ;;  %p240_p3 = scmp.ne.s32.totalorder %s859_s28, %s855_s27 }
   0x8   : > { %s1098_s13 = smov (%p35_p0, %s33_s13), 0  ;;  %p241_p5 = scmp.eq.s32.totalorder %s689_s12, 1 }
   0x9   : > { %p967_p4 = por %p235_p2, %p234_p1  ;;  %s219_s16 = ssub.s32 %s871_s9, %s1098_s13 }
   0xa   : > { %p692_p6 = scmp.ge.s32.totalorder %s875_s10, 1  ;;  %p222_p7 = scmp.eq.s32.totalorder %s219_s16, 0 }
   0xb   : > { %p974_p8 = por %p241_p5, %p240_p3  ;;  %p300_p9 = scmp.lt.s32.totalorder %s875_s10, 3 }
   0xc   : > { %s980_s18 = scalar_select %p222_p7, %s863_s29, %s224_s14  }
   0xd   : > { %p301_p10 = pnand %p692_p6, %p300_p9 }
   0xe   : > { %p346_p11 = scmp.lt.s32.totalorder (!%p301_p10), %s867_s30, 1  ;;  %s877_s12 = smov (!%p301_p10), 124  }
   0xf   : > { %304 = sbr.rel (%p301_p10) target bundleno = 791 (0x317), region = 52  ;;  %s878_s14 = smov (!%p301_p10), 126  }
  0x10   : > { %s879_s16 = smov (!%p301_p10), 4   ;;  %s705_s21 = sshll.u32 (!%p301_p10), %s867_s30, 3 }
  0x14   : > { %s347_s19 = scalar_select %p346_p11, %s867_s30, 1  ;;  %vm392_vm0 = vcmask 1043456   ;;  %vm380_vm1 = vcmask 1031168   ;;  %vm390_vm2 = vcmask 1014784   ;;  %v397_v16 = vld [vmem:[%s1084_s3] sm:$0xff]  ;;  %v880_v17 = vmov 0  }
  0x15   : > { %779 = vset.pattern.permute.xlu0 %v880_v17  ;;  %795 = vset.pattern.permute.xlu1 %v880_v17  ;;  %vm418_vm3 = vcmask 31744   ;;  %v396_v25 = vld [vmem:[%s1083_s2] sm:$0xff]  ;;  %vm425_vm4 = vcmask 97280   ;;  %v881_v30 = vmov 0.0   ;;  %vm522_vm5 = vcmask 195584  }
  0x16   : > { %s708_s20 = sshll.u32 %s347_s19, 3  ;;  %s696_s24 = sshll.u32 %s347_s19, 2  ;;  %796 = vset.pattern.permute.xlu2 %v880_v17  ;;  %v547_v44 = vld [vmem:[%s1087_s6] sm:$0xff] }
  0x17   : > { %s353_s23 = scalar_lea.vmem %s1081_s0, %s708_s20  ;;  %s361_s11 = scalar_lea.vmem %s1082_s1, %s696_s24  ;;  %v501_v47 = vld [vmem:[%s1086_s5] sm:$0xff] }
  0x18   : > { %v362_v0 = vld [vmem:[%s353_s23] sm:$0xff]  ;;  %s342_s19 = sand.u32 1, %s859_s28   ;;  %s594_s24 = scalar_lea.hbm %s1089_s8, %s705_s21 }
  0x19   : > { %365 = vst [vmem:[#allocation1] ss:$2 sm:$0xff] %v362_v0  ;;  %v363_v1 = vld [vmem:[%s361_s11] sm:$0xf]  ;;  %s693_s20 = sshll.u32 %s342_s19, 3  ;;  %s598_s11 = sshll.u32 %s594_s24, 4  ;;  %s599_s11 = int_to_ptr.hbm [resolvable:$true] %s598_s11 }
  0x1a   : > { %v373_v2 = vrot.slane %v363_v1, 4  ;;  %702 = vmatpush.msk.msra.mxu3 %vm392_vm0, %v363_v1  ;;  %v548_v48 = vld [vmem:[%s1088_s7] sm:$0xff]  ;;  %s344_s25 = scalar_lea.vmem [#allocation2], %s693_s20  ;;  %s817_s21 = scalar_lea.hbm %s1089_s8, 16 }
  0x1b   : > { %703 = vmatmul.msk.f32.vlgmr.msra.gmra.mxu3 %vm418_vm3, %v547_v44  ;;  %v500_v57 = vld [vmem:[%s1085_s4] sm:$0xff]  ;;  %s596_s26 = sshll.u32 %s344_s25, 4  ;;  %s597_s26 = int_to_ptr.vmem [resolvable:$true] %s596_s26 }
  0x20   : > { %v367_v3 = vld.sshfl [vmem:[#allocation1 + $0x8] sm:$0xff pattern:$0x75316420]  ;;  %v366_v32 = vld.sshfl [vmem:[#allocation1] sm:$0xff pattern:$0x75316420] }
  0x21   : > { %386 = vrot.lane.b32.xlu0 %v367_v3, %s877_s12  ;;  %v372_v4 = vrot.slane %v367_v3, 4  ;;  %v371_v33 = vrot.slane %v366_v32, 4 }
  0x23   : > { %v769_v5 = vpack.i.bf16 %v373_v2, %v372_v4 }
  0x25   : > { %770 = vrot.lane.b32.xlu1 %v769_v5, %s878_s14 }
  0x29   : > { %388 = vrot.lane.b32.xlu0 %v363_v1, %s877_s12 }
  0x31   : > { %400 = vperm.xlu0 %779, %v397_v16  }
  0x93   : > { %v387_v6 = vpop.permute.xlu0 %386 }
  0x97   : > { %v771_v7 = vpop.permute.xlu1 %770 }
  0x98   : > { %v773_v8 = vunpack.i.h.bf16 %v771_v7  ;;  %v772_v9 = vunpack.i.l.bf16 %v771_v7 }
  0x9a   : > { %v382_v10 = vsel %vm380_vm1, %v772_v9, %v773_v8  ;;  %v395_v14 = vsel %vm392_vm0, %v363_v1, %v773_v8 }
  0x9b   : > { %v389_v11 = vpop.permute.xlu0 %388  ;;  %v394_v13 = vsel %vm392_vm0, %v367_v3, %v382_v10 }
  0x9c   : > { %416 = vrot.lane.b32.xlu2 %v389_v11, %s879_s16  ;;  %v391_v12 = vsel %vm390_vm2, %v387_v6, %v389_v11  ;;  %v774_v15 = vpack.i.bf16 %v395_v14, %v394_v13 }
  0x9d   : > { %414 = vrot.lane.b32.xlu1 %v391_v12, %s879_s16 }
  0x9e   : > { %v576_v62 = vpop.f32.mrf.mxu3 }
  0xa3   : > { %v401_v26 = vpop.permute.xlu0 %400 }
  0xa4   : > { %775 = vrot.lane.b32.xlu2 %v774_v15, %s879_s16 }
  0xf6   : > { %v417_v18 = vpop.permute.xlu2 %416 }
  0xfe   : > { %v1003_v19 = vpop.permute.xlu2 %775 }
  0xff   : > { %v778_v20 = vunpack.i.h.bf16 %v1003_v19  ;;  %v777_v21 = vunpack.i.l.bf16 %v1003_v19 }
 0x101   : > { %v420_v24 = vsel %vm418_vm3, %v777_v21, %v778_v20 }
 0x10f   : > { %v415_v22 = vpop.permute.xlu1 %414 }
 0x110   : > { %v422_v23 = vsel %vm418_vm3, %v415_v22, %v417_v18 }
 0x111   : > { %699 = vmatpush.msk.msra.mxu1 %vm392_vm0, %v422_v23 }
 0x113   : > { %468 = vmatpush.msra.mxu1 %v420_v24 }
 0x114   : > { %700 = vmatmul.msk.f32.vlgmr.msra.gmra.mxu1 %vm425_vm4, %v396_v25 }
 0x191   : > { %v470_v27 = vpop.f32.mrf.mxu1 }
 0x192   : > { %v471_v28 = vadd.f32 %v470_v27, %v401_v26 }
 0x194   : > { %v474_v29 = vmax.f32 %v471_v28, 0.0 }
 0x196   : > { %498 = vrot.lane.b32.xlu2 %v474_v29, %s877_s12  ;;  %v780_v31 = vpack.i.bf16 %v474_v29, %v881_v30  ;;  %s583_s12 = scalar_lea.sflag [#allocation3], %s342_s19 }
 0x198   : > { %781 = vrot.lane.b32.xlu1 %v780_v31, %s878_s14 }
 0x1a0   : > { %374 = vrot.lane.b32.xlu1 %v371_v33, %s878_s14  ;;  %s811_s14 = sshra.s32 %s599_s11, 4  ;;  %s812_s14 = int_to_ptr.hbm [resolvable:$true] %s811_s14 }
 0x1a1   : > { %s813_s30 = scalar_lea.hbm %s812_s14, 8  ;;  %p818_p1 = scmp.lt.s32.totalorder %s812_s14, %s1089_s8 }
 0x1a2   : > { %p814_p12 = scmp.ne.s32.totalorder %s812_s14, %s813_s30  ;;  %p819_p2 = scmp.lt.s32.totalorder %s817_s21, %s813_s30 }
 0x1a4   : > { %p815_p13 = pnand %p814_p12, %p967_p4  ;;  %p820_p3 = por %p819_p2, %p818_p1 }
 0x1a6   : > { %p816_p0 = pneg %p815_p13 }
 0x1a8   : > { %509 = vrot.lane.b32.xlu1 %v474_v29, %s879_s16  ;;  %p821_p5 = pnand %p820_p3, %p816_p0 }
 0x1b0   : > { %504 = vperm.xlu1 %795, %v501_v47  }
 0x1f0   : > { %v499_v37 = vpop.permute.xlu2 %498 }
 0x20a   : > { %v782_v34 = vpop.permute.xlu1 %781 }
 0x20b   : > { %v784_v35 = vunpack.i.h.bf16 %v782_v34  ;;  %v783_v36 = vunpack.i.l.bf16 %v782_v34 }
 0x20d   : > { %v790_v38 = vpack.i.bf16 0.0, %v784_v35  ;;  %v497_v39 = vsel %vm380_vm1, %v783_v36, %v784_v35 }
 0x20e   : > { %v785_v40 = vpack.i.bf16 %v497_v39, %v499_v37 }
 0x20f   : > { %791 = vrot.lane.b32.xlu0 %v790_v38, %s879_s16 }
 0x210   : > { %786 = vrot.lane.b32.xlu2 %v785_v40, %s879_s16 }
 0x212   : > { %v375_v41 = vpop.permute.xlu1 %374 }
 0x213   : > { %v381_v42 = vsel %vm380_vm1, %v375_v41, %v772_v9 }
 0x214   : > { %v393_v43 = vsel %vm392_vm0, %v366_v32, %v381_v42 }
 0x217   : > { %406 = vrot.lane.b32.xlu0 %v393_v43, %s879_s16 }
 0x218   : > { %412 = vrot.lane.b32.xlu2 %v387_v6, %s879_s16 }
 0x21a   : > { %v510_v56 = vpop.permute.xlu1 %509 }
 0x220   : > { %551 = vperm.xlu2 %796, %v548_v48  }
 0x222   : > { %v505_v61 = vpop.permute.xlu1 %504 }
 0x26a   : > { %v787_v45 = vpop.permute.xlu2 %786 }
 0x26b   : > { %v788_v46 = vunpack.i.l.bf16 %v787_v45  ;;  %v789_v52 = vunpack.i.h.bf16 %v787_v45 }
 0x26d   : > { %539 = vmatpush.msra.mxu2 %v788_v46 }
 0x272   : > { %v413_v49 = vpop.permute.xlu2 %412 }
 0x273   : > { %v421_v50 = vsel %vm418_vm3, %v413_v49, %v415_v22 }
 0x274   : > { %697 = vmatpush.msk.msra.mxu0 %vm392_vm0, %v421_v50 }
 0x27a   : > { %v552_v63 = vpop.permute.xlu2 %551 }
 0x27b   : > { %v577_v3 = vadd.f32 %v576_v62, %v552_v63 }
 0x281   : > { %v792_v51 = vpop.permute.xlu0 %791 }
 0x282   : > { %v794_v53 = vunpack.i.h.bf16 %v792_v51  ;;  %v793_v54 = vunpack.i.l.bf16 %v792_v51 }
 0x284   : > { %v518_v55 = vsel %vm418_vm3, %v789_v52, %v793_v54  ;;  %v517_v58 = vsel %vm418_vm3, %v794_v53, %v510_v56 }
 0x285   : > { %540 = vmatpush.msra.mxu2 %v518_v55 }
 0x287   : > { %541 = vmatpush.msra.mxu2 %v517_v58 }
 0x288   : > { %701 = vmatmul.msk.f32.vlgmr.msra.gmra.mxu2 %vm522_vm5, %v500_v57 }
 0x289   : > { %v407_v59 = vpop.permute.xlu0 %406 }
 0x28a   : > { %v419_v60 = vsel %vm418_vm3, %v407_v59, %v777_v21 }
 0x28b   : > { %448 = vmatpush.msra.mxu0 %v419_v60 }
 0x28c   : > { %698 = vmatmul.msk.f32.vlgmr.msra.gmra.mxu0 %vm425_vm4, %v396_v25 }
 0x309   : > { %v450_v0 = vpop.f32.mrf.mxu0 }
 0x30b   : > { %v543_v1 = vpop.f32.mrf.mxu2 }
 0x30c   : > { %v544_v2 = vadd.f32 %v543_v1, %v505_v61 }
 0x30e   : > { %v546_v4 = vmax.f32 %v544_v2, 0.0 }
 0x310   : > { %v579_v5 = vadd.f32 %v577_v3, %v546_v4 }
 0x312   : > { %v580_v6 = vmax.f32 %v579_v5, 0.0 }
 0x314   : > { %581 = vst [vmem:[%s344_s25] sm:$0xff] %v580_v6 }
 0x315   : > { %824 = shalt.err (!%p821_p5)
}
 0x316   : > { %709 = dma.vmem_to_hbm [thread:$0]  (%p967_p4), %s597_s26, 128, %s599_s11, %s583_s12  }
 0x317 PF: > { %p715_p6 = scmp.ge.s32.totalorder %s875_s10, 2  ;;  %s610_s19 = sand.u32 1, %s855_s27  }
 0x318   : > { %s611_s24 = scalar_lea.sflag [#allocation3], %s610_s19 }
 0x319   : > { %p712_p7 = pnand %p715_p6, %p974_p8 }
 0x31b   : > { %p713_p9 = pneg %p712_p7 }
 0x31d   : > { %850 = dma.done.wait (%p713_p9), %s611_s24, 128  }
 0x31e   : > { %852 = vsyncadd (%p713_p9), %s611_s24, 4294967168  ;;  %s21_s10 = sadd.s32 1, %s875_s10   ;;  %s1092_s27 = smov %s859_s28 }
 0x31f   : > { %p18_p10 = scmp.ge.s32.totalorder %s21_s10, 4   ;;  %s1093_s28 = smov %s863_s29 }
 0x320   : > { %s1094_s29 = smov %s980_s18  ;;  %s1095_s30 = smov %s871_s9 }
 0x321   : > { %s1096_s9 = smov %s1098_s13  ;;  %20 = sbr.rel (!%p18_p10) target bundleno = 4 (0x4), region = 90 }
 0x326   :  { %617 = vsyncpa [#allocation3], 1 }
 0x327   :  { %619 = vsyncpa [#allocation3 + $0x1], 1 }

</bundles_post_ra>
